<compile_context>
chip_gen: v7x
topology: tpu7x:2x2x1
jax: 0.10.0
libtpu: 0.0.40
codegen_flags: <defaults>
</compile_context>

<pallas_src>
import jax
import jax.numpy as jnp
from jax.experimental import pallas as pl
from jax.experimental.pallas import tpu as pltpu


def fm_kernel(x_ref, o_ref):
    # x_ref: (F, E, TB) tile in VMEM with batch on the lane axis.  o_ref: (1, TB).
    x = x_ref[...].astype(jnp.float32)                        # (F, E, TB)
    s = jnp.sum(x, axis=0)                                    # field sum     -> (E, TB)
    square_of_sum = s * s                                     # (E, TB)
    sum_of_square = jnp.sum(x * x, axis=0)                    # (E, TB)
    cross_term = square_of_sum - sum_of_square                # (E, TB)
    out = 0.5 * jnp.sum(cross_term, axis=0, keepdims=True)    # (1, TB)
    o_ref[...] = out.astype(o_ref.dtype)


def _round_up(n, m):
    return ((n + m - 1) // m) * m


def fm_forward(x, *, target_tile_bytes=2 * 1024 * 1024):
    """x: (B, F, E) float array -> (B, 1). Same semantics as the PyTorch FM module."""
    B, F, E = x.shape

    # Batch-in-lanes layout: (F, E, B).
    xt = jnp.transpose(x, (1, 2, 0))

    # Batch tile: multiple of 128 lanes, ~target_tile_bytes per input tile,
    # never larger than the (lane-padded) batch itself.  2 MiB x double buffering
    # keeps us far below the scoped-VMEM limit on v5e/v6e/v7x.
    bytes_per_batch_elem = F * E * x.dtype.itemsize
    tb = max(128, (target_tile_bytes // bytes_per_batch_elem) // 128 * 128)
    tb = min(tb, _round_up(B, 128))

    b_pad = _round_up(B, tb)
    if b_pad != B:
        # Zero rows contribute exactly 0 to the FM cross term -> padding is safe.
        xt = jnp.pad(xt, ((0, 0), (0, 0), (0, b_pad - B)))

    grid = (b_pad // tb,)
    out = pl.pallas_call(
        fm_kernel,
        out_shape=jax.ShapeDtypeStruct((1, b_pad), jnp.float32),
        grid=grid,
        in_specs=[pl.BlockSpec((F, E, tb), lambda b: (0, 0, b))],
        out_specs=pl.BlockSpec((1, tb), lambda b: (0, b)),
        compiler_params=pltpu.CompilerParams(
            dimension_semantics=("parallel",),
        ),
    )(xt)

    return out[0, :B].reshape(B, 1).astype(x.dtype)


def fm_reference(x):
    xf = x.astype(jnp.float32)
    square_of_sum = jnp.sum(xf, axis=1, keepdims=True) ** 2
    sum_of_square = jnp.sum(xf * xf, axis=1, keepdims=True)
    cross_term = square_of_sum - sum_of_square
    return (0.5 * jnp.sum(cross_term, axis=2)).astype(x.dtype)


if __name__ == "__main__":
    # FM has no learnable parameters; only the input tensor is needed.
    B, F, E = 2, 8, 32  # (batch_size, field_size, embedding_size)
    key = jax.random.PRNGKey(0)
    x = jax.random.normal(key, (B, F, E), dtype=jnp.float32)

    out = fm_forward(x)
    jax.block_until_ready(out)

    ref = fm_reference(x)
    assert out.shape == (B, 1), out.shape
    assert jnp.allclose(out, ref, atol=1e-4, rtol=1e-4), (out, ref)

    # Exercise the multi-tile / padded / bf16 path (DeepCTR-like shape).
    B2, F2, E2 = 4096, 39, 16
    x2 = jax.random.normal(jax.random.PRNGKey(1), (B2, F2, E2), dtype=jnp.bfloat16)
    out2 = fm_forward(x2)
    jax.block_until_ready(out2)
    ref2 = fm_reference(x2)
    assert out2.shape == (B2, 1), out2.shape
    assert jnp.allclose(out2.astype(jnp.float32), ref2.astype(jnp.float32),
                        atol=5e-1, rtol=5e-2)

    print("KERNEL_OK")
</pallas_src>

<mosaic_0001>
module attributes {stable_mosaic.version = 11 : i64} {
  func.func @fm_kernel(%arg0: i32, %arg1: memref<8x32x128xf32, #tpu.memory_space<vmem>>, %arg2: memref<1x128xf32, #tpu.memory_space<vmem>>) attributes {dimension_semantics = [#tpu.dimension_semantics<parallel>], iteration_bounds = array<i64: 1>, scalar_prefetch = 0 : i64, scratch_operands = 0 : i64, tpu.core_type = #tpu.core_type<tc>, window_params = [{transform_indices = @transform_0, window_bounds = array<i64: 8, 32, 128>}, {transform_indices = @transform_1, window_bounds = array<i64: 1, 128>}]} {
    %c0 = arith.constant 0 : index
    %c0_0 = arith.constant 0 : index
    %c0_1 = arith.constant 0 : index
    %0 = vector.load %arg1[%c0, %c0_0, %c0_1] : memref<8x32x128xf32, #tpu.memory_space<vmem>>, vector<8x32x128xf32>
    %cst = arith.constant dense<0.000000e+00> : vector<32x128xf32>
    %1 = vector.multi_reduction <add>, %0, %cst [0] : vector<8x32x128xf32> to vector<32x128xf32>
    %2 = arith.mulf %1, %1 : vector<32x128xf32>
    %3 = arith.mulf %0, %0 : vector<8x32x128xf32>
    %cst_2 = arith.constant dense<0.000000e+00> : vector<32x128xf32>
    %4 = vector.multi_reduction <add>, %3, %cst_2 [0] : vector<8x32x128xf32> to vector<32x128xf32>
    %5 = arith.subf %2, %4 : vector<32x128xf32>
    %cst_3 = arith.constant dense<0.000000e+00> : vector<128xf32>
    %6 = vector.multi_reduction <add>, %5, %cst_3 [0] : vector<32x128xf32> to vector<128xf32>
    %7 = vector.shape_cast %6 : vector<128xf32> to vector<1x128xf32>
    %cst_4 = arith.constant 5.000000e-01 : f32
    %8 = vector.broadcast %cst_4 : f32 to vector<1x128xf32>
    %9 = arith.mulf %8, %7 : vector<1x128xf32>
    %c0_5 = arith.constant 0 : index
    %c0_6 = arith.constant 0 : index
    %10 = vector.load %arg2[%c0_5, %c0_6] : memref<1x128xf32, #tpu.memory_space<vmem>>, vector<1x128xf32>
    tpu.vector_store %arg2[%c0_5, %c0_6], %9 {strides = array<i32>} : memref<1x128xf32, #tpu.memory_space<vmem>>, vector<1x128xf32>,
    return
  }
  func.func @transform_0(%arg0: i32) -> (i32, i32, i32) {
    %c0_i32 = arith.constant 0 : i32
    %c0_i32_0 = arith.constant 0 : i32
    %c0_i32_1 = arith.constant 0 : i32
    return %c0_i32, %c0_i32_0, %arg0 : i32, i32, i32
  }
  func.func @transform_1(%arg0: i32) -> (i32, i32) {
    %c0_i32 = arith.constant 0 : i32
    %c0_i32_0 = arith.constant 0 : i32
    return %c0_i32, %arg0 : i32, i32
  }
}

</mosaic_0001>

<bundles_post_ra>
// kernel: tpu_custom_call.1
= control target key start
LH: loop header
LB: loop body
LE: loop exit
PB: predicated region body
PF: predicated region fallthrough
CT: control target
= control target key end

     0   :  { %6 = vsyncpa [#allocation3], 0  ;;  %s267_s0 = inlined_call_operand.hbm [shape: f32[8,32,128], index: 0, kind: input, shape index: {}]   ;;  %s268_s1 = inlined_call_operand.hbm [shape: f32[1,128], index: 1, kind: output, shape index: {}]  }
   0x1   :  { %7 = vsyncpa [#allocation4], 0  ;;  %s229_s6 = smov [#allocation2]   ;;  %s181_s10 = scalar_lea.hbm %s267_s0, 4096 }
   0x2   :  { %s13_s7 = sshll.u32 %s229_s6, 4  ;;  %p182_p0 = scmp.ne.s32.totalorder %s267_s0, %s181_s10  ;;  %s14_s7 = int_to_ptr.vmem [resolvable:$true] %s13_s7 }
   0x3   :  { %p185_p1 = scmp.lt.u32.totalorder %s181_s10, %s267_s0 }
   0x5   :  { %p187_p2 = pnand %p185_p1, %p182_p0 }
   0x7   :  { %190 = shalt.err (!%p187_p2)
}
   0x8   :  { %s191_s15 = scalar_lea.vmem %s14_s7, 4096  ;;  %p196_p4 = scmp.lt.s32.totalorder %s14_s7, %s14_s7 }
   0x9   :  { %p192_p3 = scmp.ne.s32.totalorder %s14_s7, %s191_s15  ;;  %p197_p5 = scmp.lt.s32.totalorder %s191_s15, %s191_s15 }
   0xb   :  { %p198_p6 = por %p197_p5, %p196_p4 }
   0xd   :  { %p199_p7 = pnand %p198_p6, %p192_p3 }
   0xf   :  { %202 = shalt.err (!%p199_p7)
}
  0x10   :  { %s230_s16 = smov 128   ;;  %s231_s17 = smov 8  }
  0x11   :  { %19 = dma.hbm_to_vmem [thread:$0]  %s267_s0, 4096, %s14_s7, [#allocation3], %s230_s16, %s230_s16, %s231_s17  }
  0x12   :  { %225 = dma.done.wait [#allocation3], 4096  }
  0x13   :  { %226 = vsyncadd [#allocation3], 4294963200  ;;  %v23_v0 = vld [vmem:[#allocation2] sm:$0xff]  ;;  %v24_v1 = vld [vmem:[#allocation2 + $0x8] sm:$0xff]  ;;  %s232_s0 = smov [#allocation5]  }
  0x14   :  { %v25_v2 = vld [vmem:[#allocation2 + $0x10] sm:$0xff]  ;;  %v26_v3 = vld [vmem:[#allocation2 + $0x18] sm:$0xff]  ;;  %v27_v4 = vld [vmem:[#allocation2 + $0x20] sm:$0xff]  ;;  %v87_v32 = vmul.f32 %v23_v0, %v23_v0  ;;  %v88_v33 = vmul.f32 %v24_v1, %v24_v1  ;;  %s168_s20 = sshll.u32 %s232_s0, 4  ;;  %s169_s20 = int_to_ptr.vmem [resolvable:$true] %s168_s20 }
  0x15   :  { %v28_v5 = vld [vmem:[#allocation2 + $0x28] sm:$0xff]  ;;  %v29_v6 = vld [vmem:[#allocation2 + $0x30] sm:$0xff]  ;;  %v30_v7 = vld [vmem:[#allocation2 + $0x38] sm:$0xff]  ;;  %v55_v9 = vadd.f32 %v27_v4, %v23_v0  ;;  %v89_v36 = vmul.f32 %v25_v2, %v25_v2  ;;  %v90_v37 = vmul.f32 %v26_v3, %v26_v3  ;;  %v91_v41 = vmul.f32 %v27_v4, %v27_v4  ;;  %s203_s21 = scalar_lea.vmem %s169_s20, 16  ;;  %s207_s22 = scalar_lea.vmem %s169_s20, 32 }
  0x16   :  { %v31_v8 = vld [vmem:[#allocation2 + $0x40] sm:$0xff]  ;;  %v62_v10 = vadd.f32 %v28_v5, %v24_v1  ;;  %v32_v11 = vld [vmem:[#allocation2 + $0x48] sm:$0xff]  ;;  %v33_v12 = vld [vmem:[#allocation2 + $0x50] sm:$0xff]  ;;  %v69_v14 = vadd.f32 %v29_v6, %v25_v2  ;;  %v76_v15 = vadd.f32 %v30_v7, %v26_v3  ;;  %v92_v42 = vmul.f32 %v28_v5, %v28_v5  ;;  %p204_p8 = scmp.ne.s32.totalorder %s169_s20, %s203_s21  ;;  %p208_p9 = scmp.lt.s32.totalorder %s169_s20, %s169_s20 }
  0x17   :  { %v34_v13 = vld [vmem:[#allocation2 + $0x58] sm:$0xff]  ;;  %v35_v16 = vld [vmem:[#allocation2 + $0x60] sm:$0xff]  ;;  %v36_v17 = vld [vmem:[#allocation2 + $0x68] sm:$0xff]  ;;  %v56_v19 = vadd.f32 %v55_v9, %v31_v8  ;;  %v93_v43 = vmul.f32 %v29_v6, %v29_v6  ;;  %v94_v46 = vmul.f32 %v30_v7, %v30_v7  ;;  %v95_v47 = vmul.f32 %v31_v8, %v31_v8  ;;  %p209_p10 = scmp.lt.s32.totalorder %s207_s22, %s203_s21 }
  0x18   :  { %v37_v18 = vld [vmem:[#allocation2 + $0x70] sm:$0xff]  ;;  %v63_v20 = vadd.f32 %v62_v10, %v32_v11  ;;  %v38_v21 = vld [vmem:[#allocation2 + $0x78] sm:$0xff]  ;;  %v70_v22 = vadd.f32 %v69_v14, %v33_v12  ;;  %v77_v23 = vadd.f32 %v76_v15, %v34_v13  ;;  %v39_v26 = vld [vmem:[#allocation2 + $0x80] sm:$0xff]  ;;  %v96_v48 = vmul.f32 %v32_v11, %v32_v11 }
  0x19   :  { %v57_v24 = vadd.f32 %v56_v19, %v35_v16  ;;  %v40_v27 = vld [vmem:[#allocation2 + $0x88] sm:$0xff]  ;;  %v41_v29 = vld [vmem:[#allocation2 + $0x90] sm:$0xff]  ;;  %v42_v31 = vld [vmem:[#allocation2 + $0x98] sm:$0xff]  ;;  %v97_v50 = vmul.f32 %v33_v12, %v33_v12  ;;  %v98_v51 = vmul.f32 %v34_v13, %v34_v13  ;;  %v99_v52 = vmul.f32 %v35_v16, %v35_v16  ;;  %p210_p11 = por %p209_p10, %p208_p9 }
  0x1a   :  { %v64_v25 = vadd.f32 %v63_v20, %v36_v17  ;;  %v71_v28 = vadd.f32 %v70_v22, %v37_v18  ;;  %v78_v30 = vadd.f32 %v77_v23, %v38_v21  ;;  %v43_v38 = vld [vmem:[#allocation2 + $0xa0] sm:$0xff]  ;;  %v44_v39 = vld [vmem:[#allocation2 + $0xa8] sm:$0xff]  ;;  %v45_v44 = vld [vmem:[#allocation2 + $0xb0] sm:$0xff]  ;;  %v100_v53 = vmul.f32 %v36_v17, %v36_v17 }
  0x1b   :  { %v58_v34 = vadd.f32 %v57_v24, %v39_v26  ;;  %v46_v49 = vld [vmem:[#allocation2 + $0xb8] sm:$0xff]  ;;  %v101_v56 = vmul.f32 %v37_v18, %v37_v18  ;;  %v102_v57 = vmul.f32 %v38_v21, %v38_v21  ;;  %v47_v58 = vld [vmem:[#allocation2 + $0xc0] sm:$0xff]  ;;  %v48_v59 = vld [vmem:[#allocation2 + $0xc8] sm:$0xff]  ;;  %v103_v61 = vmul.f32 %v39_v26, %v39_v26  ;;  %p211_p12 = pnand %p210_p11, %p204_p8 }
  0x1c   :  { %v65_v35 = vadd.f32 %v64_v25, %v40_v27  ;;  %v72_v40 = vadd.f32 %v71_v28, %v41_v29  ;;  %v79_v45 = vadd.f32 %v78_v30, %v42_v31  ;;  %v104_v62 = vmul.f32 %v40_v27, %v40_v27  ;;  %v49_v0 = vld [vmem:[#allocation2 + $0xd0] sm:$0xff]  ;;  %v50_v5 = vld [vmem:[#allocation2 + $0xd8] sm:$0xff]  ;;  %v51_v14 = vld [vmem:[#allocation2 + $0xe0] sm:$0xff] }
  0x1d   :  { %v59_v54 = vadd.f32 %v58_v34, %v43_v38  ;;  %v105_v63 = vmul.f32 %v41_v29, %v41_v29  ;;  %v106_v2 = vmul.f32 %v42_v31, %v42_v31  ;;  %v107_v3 = vmul.f32 %v43_v38, %v43_v38  ;;  %v52_v15 = vld [vmem:[#allocation2 + $0xe8] sm:$0xff]  ;;  %v53_v20 = vld [vmem:[#allocation2 + $0xf0] sm:$0xff]  ;;  %v54_v25 = vld [vmem:[#allocation2 + $0xf8] sm:$0xff] }
  0x1e   :  { %v66_v55 = vadd.f32 %v65_v35, %v44_v39  ;;  %v73_v60 = vadd.f32 %v72_v40, %v45_v44  ;;  %v80_v1 = vadd.f32 %v79_v45, %v46_v49  ;;  %v119_v4 = vadd.f32 %v91_v41, %v87_v32 }
  0x1f   :  { %v108_v6 = vmul.f32 %v44_v39, %v44_v39  ;;  %v109_v7 = vmul.f32 %v45_v44, %v45_v44  ;;  %v126_v8 = vadd.f32 %v92_v42, %v88_v33  ;;  %v133_v9 = vadd.f32 %v93_v43, %v89_v36 }
  0x20   :  { %v60_v10 = vadd.f32 %v59_v54, %v47_v58  ;;  %v67_v11 = vadd.f32 %v66_v55, %v48_v59  ;;  %v120_v12 = vadd.f32 %v119_v4, %v95_v47  ;;  %v140_v13 = vadd.f32 %v94_v46, %v90_v37 }
  0x21   :  { %v74_v16 = vadd.f32 %v73_v60, %v49_v0  ;;  %v110_v17 = vmul.f32 %v46_v49, %v46_v49  ;;  %v127_v18 = vadd.f32 %v126_v8, %v96_v48  ;;  %v134_v19 = vadd.f32 %v133_v9, %v97_v50 }
  0x22   :  { %v81_v21 = vadd.f32 %v80_v1, %v50_v5  ;;  %v111_v22 = vmul.f32 %v47_v58, %v47_v58  ;;  %v121_v23 = vadd.f32 %v120_v12, %v99_v52  ;;  %v141_v24 = vadd.f32 %v140_v13, %v98_v51 }
  0x23   :  { %v112_v26 = vmul.f32 %v48_v59, %v48_v59  ;;  %v113_v27 = vmul.f32 %v49_v0, %v49_v0  ;;  %v128_v28 = vadd.f32 %v127_v18, %v100_v53  ;;  %v135_v29 = vadd.f32 %v134_v19, %v101_v56 }
  0x24   :  { %v61_v30 = vadd.f32 %v60_v10, %v51_v14  ;;  %v68_v31 = vadd.f32 %v67_v11, %v52_v15  ;;  %v122_v32 = vadd.f32 %v121_v23, %v103_v61  ;;  %v142_v33 = vadd.f32 %v141_v24, %v102_v57 }
  0x25   :  { %v75_v34 = vadd.f32 %v74_v16, %v53_v20  ;;  %v114_v35 = vmul.f32 %v50_v5, %v50_v5  ;;  %v129_v36 = vadd.f32 %v128_v28, %v104_v62  ;;  %v136_v37 = vadd.f32 %v135_v29, %v105_v63 }
  0x26   :  { %v82_v38 = vadd.f32 %v81_v21, %v54_v25  ;;  %v115_v39 = vmul.f32 %v51_v14, %v51_v14  ;;  %v123_v40 = vadd.f32 %v122_v32, %v107_v3  ;;  %v143_v41 = vadd.f32 %v142_v33, %v106_v2 }
  0x27   :  { %v116_v42 = vmul.f32 %v52_v15, %v52_v15  ;;  %v117_v43 = vmul.f32 %v53_v20, %v53_v20  ;;  %v130_v44 = vadd.f32 %v129_v36, %v108_v6  ;;  %v137_v45 = vadd.f32 %v136_v37, %v109_v7 }
  0x28   :  { %v83_v46 = vmul.f32 %v61_v30, %v61_v30  ;;  %v118_v47 = vmul.f32 %v54_v25, %v54_v25  ;;  %v124_v48 = vadd.f32 %v123_v40, %v111_v22  ;;  %v144_v49 = vadd.f32 %v143_v41, %v110_v17 }
  0x29   :  { %v84_v50 = vmul.f32 %v68_v31, %v68_v31  ;;  %v85_v51 = vmul.f32 %v75_v34, %v75_v34  ;;  %v131_v52 = vadd.f32 %v130_v44, %v112_v26  ;;  %v138_v53 = vadd.f32 %v137_v45, %v113_v27 }
  0x2a   :  { %v125_v54 = vadd.f32 %v124_v48, %v115_v39  ;;  %v145_v55 = vadd.f32 %v144_v49, %v114_v35  ;;  %v86_v56 = vmul.f32 %v82_v38, %v82_v38 }
  0x2b   :  { %v132_v57 = vadd.f32 %v131_v52, %v116_v42  ;;  %v139_v58 = vadd.f32 %v138_v53, %v117_v43 }
  0x2c   :  { %v146_v59 = vadd.f32 %v145_v55, %v118_v47  ;;  %v147_v60 = vsub.f32 %v83_v46, %v125_v54 }
  0x2d   :  { %v148_v61 = vsub.f32 %v84_v50, %v132_v57  ;;  %v149_v62 = vsub.f32 %v85_v51, %v139_v58 }
  0x2e   :  { %v150_v63 = vsub.f32 %v86_v56, %v146_v59 }
  0x2f   :  { %v151_v0 = vadd.f32 %v148_v61, %v147_v60 }
  0x31   :  { %v152_v1 = vadd.f32 %v151_v0, %v149_v62 }
  0x33   :  { %v153_v2 = vadd.f32 %v152_v1, %v150_v63 }
  0x35   :  { %v154_v3 = vrot.slane %v153_v2, 4 }
  0x37   :  { %v155_v4 = vadd.f32 %v154_v3, %v153_v2 }
  0x39   :  { %v156_v5 = vrot.slane %v155_v4, 2 }
  0x3b   :  { %v157_v6 = vadd.f32 %v156_v5, %v155_v4 }
  0x3d   :  { %v158_v7 = vrot.slane %v157_v6, 1 }
  0x3f   :  { %v159_v8 = vadd.f32 %v158_v7, %v157_v6 }
  0x41   :  { %v160_v9 = vmul.f32 0.5, %v159_v8 }
  0x43   :  { %161 = vst [vmem:[#allocation5] sm:$0x1] %v160_v9 }
  0x44   :  { %214 = shalt.err (!%p211_p12)
}
  0x45   :  { %s215_s25 = scalar_lea.hbm %s268_s1, 16 }
  0x46   :  { %p216_p13 = scmp.ne.s32.totalorder %s268_s1, %s215_s25  ;;  %p219_p0 = scmp.lt.u32.totalorder %s215_s25, %s268_s1 }
  0x48   :  { %p221_p1 = pnand %p219_p0, %p216_p13 }
  0x4a   :  { %224 = shalt.err (!%p221_p1)
}
  0x4b   :  { %171 = dma.vmem_to_hbm [thread:$0]  %s169_s20, 16, %s268_s1, [#allocation4]  }
  0x4c   :  { %227 = dma.done.wait [#allocation4], 16  }
  0x4d   :  { %228 = vsyncadd [#allocation4], 4294967280 }
  0x4e   :  { %175 = vsyncpa [#allocation3], 1 }
  0x4f   :  { %176 = vsyncpa [#allocation4], 1 }

</bundles_post_ra>
